<compile_context>
chip_gen: v6e
topology: v6e:2x2x1
jax: 0.10.0
libtpu: 0.0.40
codegen_flags: <defaults>
</compile_context>

<pallas_src>
import jax
import jax.numpy as jnp
from jax import lax
from jax.experimental import pallas as pl
from jax.experimental.pallas import tpu as pltpu

LANE = 128


def _outconv_kernel(x_ref, w_ref, b_ref, o_ref):
    # x_ref: (nB, C_in, tR, 128) VMEM     w_ref: (C_out, C_in) SMEM
    # b_ref: (C_out,)            SMEM     o_ref: (nB, C_out, tR, 128) VMEM
    nB, c_in, tR, _ = x_ref.shape
    c_out = o_ref.shape[1]

    # Rows per compute chunk: divides tR exactly (no OOB pl.ds on VMEM refs)
    # and bounds the live vreg set to ~(C_in + 1) * ch/8 per iteration.
    if tR % 32 == 0:
        ch = 32
    elif tR % 16 == 0:
        ch = 16
    elif tR % 8 == 0:
        ch = 8
    else:
        ch = tR  # small / ragged-free whole-block case (tR == full R)
    n_chunks = tR // ch

    def chunk(k, carry):
        r0 = pl.multiple_of(k * ch, ch)
        for b in range(nB):
            # Load each input-channel slab once per chunk; reuse for all C_out.
            xs = [x_ref[b, ci, pl.ds(r0, ch), :] for ci in range(c_in)]
            for co in range(c_out):
                acc = xs[0] * w_ref[co, 0]
                for ci in range(1, c_in):
                    acc = acc + xs[ci] * w_ref[co, ci]
                # Bias fused into the final store; dense (ch, 128) unmasked vst.
                o_ref[b, co, pl.ds(r0, ch), :] = (acc + b_ref[co]).astype(o_ref.dtype)
        return carry

    lax.fori_loop(0, n_chunks, chunk, 0, unroll=(n_chunks <= 8))


def _largest_divisor_le(n, cap):
    cap = max(1, min(n, cap))
    for d in range(cap, 0, -1):
        if n % d == 0:
            return d
    return 1


def outconv_pallas(x_nchw, weight, bias, *, row_target=1024):
    """1x1 Conv2d forward (PyTorch OutConv semantics).

    x_nchw: (N, C_in, H, W) float32
    weight: (C_out, C_in, 1, 1) float32   (PyTorch Conv2d layout)
    bias:   (C_out,) float32
    returns (N, C_out, H, W) float32
    """
    N, C_in, H, W = x_nchw.shape
    C_out = weight.shape[0]
    L = H * W

    w2 = weight.reshape(C_out, C_in)  # SMEM scalars
    b1 = bias                         # SMEM scalars

    # Lane-align the spatial axis: view L as (R, 128).  Free (contiguous)
    # reshape when L % 128 == 0; otherwise pad the spatial tail (small copy)
    # and slice it off again afterwards.
    L_pad = ((L + LANE - 1) // LANE) * LANE
    x_flat = x_nchw.reshape(N, C_in, L)
    if L_pad != L:
        x_flat = jnp.pad(x_flat, ((0, 0), (0, 0), (0, L_pad - L)))
    R = L_pad // LANE
    x4 = x_flat.reshape(N, C_in, R, LANE)

    # Tile selection.
    #   row_target rows/channel/step -> ~row_target*128*4*(C_in+C_out) bytes of
    #   HBM traffic per step (~3.5 MB here), double-buffered VMEM ~7 MB.
    if R <= row_target:
        tR = R                      # whole spatial axis per image in one tile
        nb_cap = max(1, row_target // max(R, 1))
        if N >= 2:
            # keep >= 2 parallel grid steps so v7x's 2 TensorCores both work
            nb_cap = min(nb_cap, N // 2)
        nB = _largest_divisor_le(N, nb_cap)   # fold batches for small images
        grid_r = 1
    else:
        tR = row_target             # multiple of 8; ragged last block is masked
        nB = 1
        grid_r = pl.cdiv(R, tR)

    grid = (N // nB, grid_r)

    out4 = pl.pallas_call(
        _outconv_kernel,
        out_shape=jax.ShapeDtypeStruct((N, C_out, R, LANE), x_nchw.dtype),
        grid_spec=pltpu.PrefetchScalarGridSpec(
            num_scalar_prefetch=0,
            grid=grid,
            in_specs=[
                # x tile: batches folded, channels next, rows on sublanes,
                # 128 spatial positions on lanes.
                pl.BlockSpec((nB, C_in, tR, LANE), lambda n, r: (n, 0, r, 0)),
                # Weights / bias live whole in SMEM (scalar reads in-kernel).
                pl.BlockSpec(memory_space=pltpu.MemorySpace.SMEM),
                pl.BlockSpec(memory_space=pltpu.MemorySpace.SMEM),
            ],
            out_specs=pl.BlockSpec((nB, C_out, tR, LANE), lambda n, r: (n, 0, r, 0)),
        ),
        compiler_params=pltpu.CompilerParams(
            dimension_semantics=("parallel", "parallel"),
        ),
    )(x4, w2, b1)

    out = out4.reshape(N, C_out, L_pad)
    if L_pad != L:
        out = out[:, :, :L]
    return out.reshape(N, C_out, H, W)


if __name__ == "__main__":
    # Deterministic setup consistent with OutConv(in_channels=4, out_channels=3)
    key = jax.random.PRNGKey(0)
    k_x, k_w, k_b = jax.random.split(key, 3)

    N, C_in, H, W = 2, 4, 16, 16
    C_out = 3

    x = jax.random.normal(k_x, (N, C_in, H, W), dtype=jnp.float32)
    weight = jax.random.normal(k_w, (C_out, C_in, 1, 1), dtype=jnp.float32) * 0.1
    bias = jax.random.normal(k_b, (C_out,), dtype=jnp.float32) * 0.1

    y = outconv_pallas(x, weight, bias)
    y = jax.block_until_ready(y)

    # Reference check (plain JAX 1x1 conv).
    ref = (jnp.einsum("nihw,oi->nohw", x, weight.reshape(C_out, C_in))
           + bias[None, :, None, None])
    assert y.shape == (N, C_out, H, W)
    assert jnp.allclose(y, ref, atol=1e-5), "mismatch vs reference"

    print("KERNEL_OK")
</pallas_src>

<mosaic_0001>
module attributes {stable_mosaic.version = 11 : i64} {
  func.func @_outconv_kernel(%arg0: i32, %arg1: i32, %arg2: memref<1x4x2x128xf32, #tpu.memory_space<vmem>>, %arg3: memref<3x4xf32, #tpu.memory_space<smem>>, %arg4: memref<3xf32, #tpu.memory_space<smem>>, %arg5: memref<1x3x2x128xf32, #tpu.memory_space<vmem>>) attributes {dimension_semantics = [#tpu.dimension_semantics<parallel>, #tpu.dimension_semantics<parallel>], iteration_bounds = array<i64: 2, 1>, scalar_prefetch = 0 : i64, scratch_operands = 0 : i64, tpu.core_type = #tpu.core_type<tc>, window_params = [{transform_indices = @transform_0, window_bounds = array<i64: 1, 4, 2, 128>}, {transform_indices = @transform_1, window_bounds = array<i64: 3, 4>}, {transform_indices = @transform_2, window_bounds = array<i64: 3>}, {transform_indices = @transform_3, window_bounds = array<i64: 1, 3, 2, 128>}]} {
    %c0_i32 = arith.constant 0 : i32
    %c2_i32 = arith.constant 2 : i32
    %0 = arith.muli %c0_i32, %c2_i32 : i32
    %1 = tpu.assume_multiple %0, 2 : i32
    %c0 = arith.constant 0 : index
    %c0_0 = arith.constant 0 : index
    %2 = arith.index_cast %1 : i32 to index
    %c0_1 = arith.constant 0 : index
    %3 = vector.load %arg2[%c0, %c0_0, %2, %c0_1] : memref<1x4x2x128xf32, #tpu.memory_space<vmem>>, vector<1x1x2x128xf32>
    %4 = vector.shape_cast %3 : vector<1x1x2x128xf32> to vector<2x128xf32>
    %c0_2 = arith.constant 0 : index
    %c1 = arith.constant 1 : index
    %5 = arith.index_cast %1 : i32 to index
    %c0_3 = arith.constant 0 : index
    %6 = vector.load %arg2[%c0_2, %c1, %5, %c0_3] : memref<1x4x2x128xf32, #tpu.memory_space<vmem>>, vector<1x1x2x128xf32>
    %7 = vector.shape_cast %6 : vector<1x1x2x128xf32> to vector<2x128xf32>
    %c0_4 = arith.constant 0 : index
    %c2 = arith.constant 2 : index
    %8 = arith.index_cast %1 : i32 to index
    %c0_5 = arith.constant 0 : index
    %9 = vector.load %arg2[%c0_4, %c2, %8, %c0_5] : memref<1x4x2x128xf32, #tpu.memory_space<vmem>>, vector<1x1x2x128xf32>
    %10 = vector.shape_cast %9 : vector<1x1x2x128xf32> to vector<2x128xf32>
    %c0_6 = arith.constant 0 : index
    %c3 = arith.constant 3 : index
    %11 = arith.index_cast %1 : i32 to index
    %c0_7 = arith.constant 0 : index
    %12 = vector.load %arg2[%c0_6, %c3, %11, %c0_7] : memref<1x4x2x128xf32, #tpu.memory_space<vmem>>, vector<1x1x2x128xf32>
    %13 = vector.shape_cast %12 : vector<1x1x2x128xf32> to vector<2x128xf32>
    %c0_8 = arith.constant 0 : index
    %c0_9 = arith.constant 0 : index
    %14 = memref.load %arg3[%c0_8, %c0_9] : memref<3x4xf32, #tpu.memory_space<smem>>
    %15 = vector.broadcast %14 : f32 to vector<2x128xf32>
    %16 = arith.mulf %4, %15 : vector<2x128xf32>
    %c0_10 = arith.constant 0 : index
    %c1_11 = arith.constant 1 : index
    %17 = memref.load %arg3[%c0_10, %c1_11] : memref<3x4xf32, #tpu.memory_space<smem>>
    %18 = vector.broadcast %17 : f32 to vector<2x128xf32>
    %19 = arith.mulf %7, %18 : vector<2x128xf32>
    %20 = arith.addf %16, %19 : vector<2x128xf32>
    %c0_12 = arith.constant 0 : index
    %c2_13 = arith.constant 2 : index
    %21 = memref.load %arg3[%c0_12, %c2_13] : memref<3x4xf32, #tpu.memory_space<smem>>
    %22 = vector.broadcast %21 : f32 to vector<2x128xf32>
    %23 = arith.mulf %10, %22 : vector<2x128xf32>
    %24 = arith.addf %20, %23 : vector<2x128xf32>
    %c0_14 = arith.constant 0 : index
    %c3_15 = arith.constant 3 : index
    %25 = memref.load %arg3[%c0_14, %c3_15] : memref<3x4xf32, #tpu.memory_space<smem>>
    %26 = vector.broadcast %25 : f32 to vector<2x128xf32>
    %27 = arith.mulf %13, %26 : vector<2x128xf32>
    %28 = arith.addf %24, %27 : vector<2x128xf32>
    %c0_16 = arith.constant 0 : index
    %29 = memref.load %arg4[%c0_16] : memref<3xf32, #tpu.memory_space<smem>>
    %30 = vector.broadcast %29 : f32 to vector<2x128xf32>
    %31 = arith.addf %28, %30 : vector<2x128xf32>
    %c0_17 = arith.constant 0 : index
    %c0_18 = arith.constant 0 : index
    %32 = arith.index_cast %1 : i32 to index
    %c0_19 = arith.constant 0 : index
    %33 = vector.load %arg5[%c0_17, %c0_18, %32, %c0_19] : memref<1x3x2x128xf32, #tpu.memory_space<vmem>>, vector<1x1x2x128xf32>
    %34 = vector.shape_cast %33 : vector<1x1x2x128xf32> to vector<2x128xf32>
    %35 = vector.shape_cast %31 : vector<2x128xf32> to vector<1x1x2x128xf32>
    tpu.vector_store %arg5[%c0_17, %c0_18, %32, %c0_19], %35 {strides = array<i32>} : memref<1x3x2x128xf32, #tpu.memory_space<vmem>>, vector<1x1x2x128xf32>,
    %c1_20 = arith.constant 1 : index
    %c0_21 = arith.constant 0 : index
    %36 = memref.load %arg3[%c1_20, %c0_21] : memref<3x4xf32, #tpu.memory_space<smem>>
    %37 = vector.broadcast %36 : f32 to vector<2x128xf32>
    %38 = arith.mulf %4, %37 : vector<2x128xf32>
    %c1_22 = arith.constant 1 : index
    %c1_23 = arith.constant 1 : index
    %39 = memref.load %arg3[%c1_22, %c1_23] : memref<3x4xf32, #tpu.memory_space<smem>>
    %40 = vector.broadcast %39 : f32 to vector<2x128xf32>
    %41 = arith.mulf %7, %40 : vector<2x128xf32>
    %42 = arith.addf %38, %41 : vector<2x128xf32>
    %c1_24 = arith.constant 1 : index
    %c2_25 = arith.constant 2 : index
    %43 = memref.load %arg3[%c1_24, %c2_25] : memref<3x4xf32, #tpu.memory_space<smem>>
    %44 = vector.broadcast %43 : f32 to vector<2x128xf32>
    %45 = arith.mulf %10, %44 : vector<2x128xf32>
    %46 = arith.addf %42, %45 : vector<2x128xf32>
    %c1_26 = arith.constant 1 : index
    %c3_27 = arith.constant 3 : index
    %47 = memref.load %arg3[%c1_26, %c3_27] : memref<3x4xf32, #tpu.memory_space<smem>>
    %48 = vector.broadcast %47 : f32 to vector<2x128xf32>
    %49 = arith.mulf %13, %48 : vector<2x128xf32>
    %50 = arith.addf %46, %49 : vector<2x128xf32>
    %c1_28 = arith.constant 1 : index
    %51 = memref.load %arg4[%c1_28] : memref<3xf32, #tpu.memory_space<smem>>
    %52 = vector.broadcast %51 : f32 to vector<2x128xf32>
    %53 = arith.addf %50, %52 : vector<2x128xf32>
    %c0_29 = arith.constant 0 : index
    %c1_30 = arith.constant 1 : index
    %54 = arith.index_cast %1 : i32 to index
    %c0_31 = arith.constant 0 : index
    %55 = vector.load %arg5[%c0_29, %c1_30, %54, %c0_31] : memref<1x3x2x128xf32, #tpu.memory_space<vmem>>, vector<1x1x2x128xf32>
    %56 = vector.shape_cast %55 : vector<1x1x2x128xf32> to vector<2x128xf32>
    %57 = vector.shape_cast %53 : vector<2x128xf32> to vector<1x1x2x128xf32>
    tpu.vector_store %arg5[%c0_29, %c1_30, %54, %c0_31], %57 {strides = array<i32>} : memref<1x3x2x128xf32, #tpu.memory_space<vmem>>, vector<1x1x2x128xf32>,
    %c2_32 = arith.constant 2 : index
    %c0_33 = arith.constant 0 : index
    %58 = memref.load %arg3[%c2_32, %c0_33] : memref<3x4xf32, #tpu.memory_space<smem>>
    %59 = vector.broadcast %58 : f32 to vector<2x128xf32>
    %60 = arith.mulf %4, %59 : vector<2x128xf32>
    %c2_34 = arith.constant 2 : index
    %c1_35 = arith.constant 1 : index
    %61 = memref.load %arg3[%c2_34, %c1_35] : memref<3x4xf32, #tpu.memory_space<smem>>
    %62 = vector.broadcast %61 : f32 to vector<2x128xf32>
    %63 = arith.mulf %7, %62 : vector<2x128xf32>
    %64 = arith.addf %60, %63 : vector<2x128xf32>
    %c2_36 = arith.constant 2 : index
    %c2_37 = arith.constant 2 : index
    %65 = memref.load %arg3[%c2_36, %c2_37] : memref<3x4xf32, #tpu.memory_space<smem>>
    %66 = vector.broadcast %65 : f32 to vector<2x128xf32>
    %67 = arith.mulf %10, %66 : vector<2x128xf32>
    %68 = arith.addf %64, %67 : vector<2x128xf32>
    %c2_38 = arith.constant 2 : index
    %c3_39 = arith.constant 3 : index
    %69 = memref.load %arg3[%c2_38, %c3_39] : memref<3x4xf32, #tpu.memory_space<smem>>
    %70 = vector.broadcast %69 : f32 to vector<2x128xf32>
    %71 = arith.mulf %13, %70 : vector<2x128xf32>
    %72 = arith.addf %68, %71 : vector<2x128xf32>
    %c2_40 = arith.constant 2 : index
    %73 = memref.load %arg4[%c2_40] : memref<3xf32, #tpu.memory_space<smem>>
    %74 = vector.broadcast %73 : f32 to vector<2x128xf32>
    %75 = arith.addf %72, %74 : vector<2x128xf32>
    %c0_41 = arith.constant 0 : index
    %c2_42 = arith.constant 2 : index
    %76 = arith.index_cast %1 : i32 to index
    %c0_43 = arith.constant 0 : index
    %77 = vector.load %arg5[%c0_41, %c2_42, %76, %c0_43] : memref<1x3x2x128xf32, #tpu.memory_space<vmem>>, vector<1x1x2x128xf32>
    %78 = vector.shape_cast %77 : vector<1x1x2x128xf32> to vector<2x128xf32>
    %79 = vector.shape_cast %75 : vector<2x128xf32> to vector<1x1x2x128xf32>
    tpu.vector_store %arg5[%c0_41, %c2_42, %76, %c0_43], %79 {strides = array<i32>} : memref<1x3x2x128xf32, #tpu.memory_space<vmem>>, vector<1x1x2x128xf32>,
    %c1_i32 = arith.constant 1 : i32
    return
  }
  func.func @transform_0(%arg0: i32, %arg1: i32) -> (i32, i32, i32, i32) {
    %c0_i32 = arith.constant 0 : i32
    %c0_i32_0 = arith.constant 0 : i32
    %c0_i32_1 = arith.constant 0 : i32
    return %arg0, %c0_i32, %arg1, %c0_i32_0 : i32, i32, i32, i32
  }
  func.func @transform_1(%arg0: i32, %arg1: i32) -> (i32, i32) {
    %c0_i32 = arith.constant 0 : i32
    %c0_i32_0 = arith.constant 0 : i32
    %c0_i32_1 = arith.constant 0 : i32
    return %c0_i32, %c0_i32_0 : i32, i32
  }
  func.func @transform_2(%arg0: i32, %arg1: i32) -> i32 {
    %c0_i32 = arith.constant 0 : i32
    %c0_i32_0 = arith.constant 0 : i32
    return %c0_i32 : i32
  }
  func.func @transform_3(%arg0: i32, %arg1: i32) -> (i32, i32, i32, i32) {
    %c0_i32 = arith.constant 0 : i32
    %c0_i32_0 = arith.constant 0 : i32
    %c0_i32_1 = arith.constant 0 : i32
    return %arg0, %c0_i32, %arg1, %c0_i32_0 : i32, i32, i32, i32
  }
}

</mosaic_0001>

<bundles_post_ra>
// kernel: tpu_custom_call.1
= control target key start
LH: loop header
LB: loop body
LE: loop exit
PB: predicated region body
PF: predicated region fallthrough
CT: control target
= control target key end

     0   :  { %s912_s0 = inlined_call_operand.hbm [shape: f32[2,4,2,128], index: 0, kind: input, shape index: {}]   ;;  %s913_s1 = inlined_call_operand.hbm [shape: f32[3,4], index: 1, kind: input, shape index: {}]   ;;  %s914_s2 = inlined_call_operand.vmem [shape: f32[3], index: 2, kind: input, shape index: {}]   ;;  %s915_s3 = inlined_call_operand.hbm [shape: f32[2,3,2,128], index: 3, kind: output, shape index: {}]  }
   0x1   :  { %917 = sst [smem:[#allocation14_spill]] %s913_s1 }
   0x2   :  { %8 = vsyncpa [#allocation3], 0 }
   0x3   :  { %10 = vsyncpa [#allocation3 + $0x1], 0 }
   0x4   :  { %11 = vsyncpa [#allocation5], 0 }
   0x5   :  { %12 = vsyncpa [#allocation6], 0 }
   0x6   :  { %13 = vsyncpa [#allocation4], 0 }
   0x7   :  { %15 = vsyncpa [#allocation4 + $0x1], 0  ;;  %s725_s12 = smov 0   ;;  %s727_s13 = smov 0  }
   0x8   :  { %s729_s14 = smov 0   ;;  %s731_s15 = smov 0  }
   0x9   :  { %s733_s16 = smov 0   ;;  %s735_s17 = smov 0  }
   0xa LB: > { %s429_s18 = sadd.s32 4294967295, %s695_s17   ;;  %s430_s19 = sadd.s32 4294967294, %s695_s17   ;;  %s695_s17 = sphi %s735_s17, %s21_s17   ;;  %s691_s16 = sphi %s733_s16, %s933_s16   ;;  %s687_s15 = sphi %s731_s15, %s932_s15   ;;  %s683_s14 = sphi %s729_s14, %s931_s14   ;;  %s679_s13 = sphi %s727_s13, %s930_s13   ;;  %s675_s12 = sphi %s725_s12, %s929_s12  }
   0xb   : > { %s42_s20 = sadd.s32 1, %s683_s14  ;;  %p49_p0 = scmp.ne.s32.totalorder %s683_s14, %s679_s13 }
   0xc   : > { %p50_p1 = scmp.eq.s32.totalorder %s695_s17, 0  ;;  %p55_p2 = scmp.ne.s32.totalorder %s679_s13, %s675_s12 }
   0xd   : > { %p763_p3 = scmp.eq.s32.totalorder %s429_s18, 0  ;;  %p123_p4 = scmp.eq.s32.totalorder %s429_s18, 1 }
   0xe   : > { %p51_p5 = por %p50_p1, %p49_p0  ;;  %p129_p6 = scmp.eq.s32.totalorder %s430_s19, 1 }
   0xf   : > { %p769_p7 = por %p763_p3, %p55_p2  ;;  %p773_p8 = por %p123_p4, %p49_p0 }
  0x10   : > { %p777_p9 = por %p129_p6, %p55_p2  ;;  %p431_p10 = scmp.ge.s32.totalorder %s695_s17, 1 }
  0x11   : > { %s920_s23 = scalar_select %p773_p8, 1, 0 }
  0x12   : > { %s921_s24 = scalar_select %p777_p9, 1, 0 }
  0x13   : > { %p136_p11 = scmp.lt.s32.totalorder %s695_s17, 3  ;;  %p495_p1 = scmp.lt.s32.totalorder %s695_s17, 2 }
  0x14   : > { %s158_s28 = sshll.u32 %s914_s2, 4  ;;  %s169_s4 = sand.u32 1, %s683_s14   ;;  %s159_s28 = int_to_ptr.vmem [resolvable:$true] %s158_s28 }
  0x15   : > { %p784_p13 = pnand %p431_p10, %p136_p11  ;;  %p794_p4 = pnand %p495_p1, %p51_p5 }
  0x16   : > { %s33_s5 = sadd.s32 1, %s691_s16  ;;  %s697_s6 = smov [#allocation7]  }
  0x17   : > { %p478_p0 = pneg %p784_p13  ;;  %s925_s1 = sld [smem:[#allocation14_spill]] }
  0x18   : > { %s564_s9 = scalar_lea.vmem %s159_s28, 16  ;;  %p572_p1 = scmp.lt.s32.totalorder %s159_s28, %s159_s28 }
  0x19   : > { %p800_p2 = pnand %p478_p0, %p763_p3  ;;  %p565_p5 = scmp.ne.s32.totalorder %s159_s28, %s564_s9 }
  0x1a   : > { %p573_p0 = scmp.lt.s32.totalorder %s564_s9, %s564_s9 }
  0x1b   : > { %p566_p6 = pneg %p800_p2 }
  0x1c   : > { %p574_p12 = por %p573_p0, %p572_p1 }
  0x1d   : > { %481 = dma.hbm_to_smem (!%p800_p2), %s925_s1, 64, %s697_s6, [#allocation5]  }
  0x1e   : > { %p567_p10 = pnand %p566_p6, %p565_p5 }
  0x20   : > { %p568_p11 = pneg %p567_p10 }
  0x22   : > { %p575_p9 = pnand %p574_p12, %p568_p11 }
  0x24   : > { %578 = shalt.err (!%p575_p9)
}
  0x25   : > { %s698_s10 = smov [#allocation8]   ;;  %p35_p8 = scmp.ge.s32.totalorder %s33_s5, 2 }
  0x26   : > { %484 = dma.vmem_to_smem (!%p800_p2), %s159_s28, 16, %s698_s10, [#allocation6]  }
  0x27   : > { %s435_s11 = sshll.u32 %s169_s4, 3  ;;  %s463_s18 = sshll.u32 %s691_s16, 7 }
  0x28   : > { %s935_s5 = smov (%p35_p8, %s33_s5), 0  ;;  %s180_s27 = scalar_lea.hbm %s912_s0, %s463_s18 }
  0x29   : > { %s37_s6 = ssub.s32 %s691_s16, %s935_s5  ;;  %s173_s7 = scalar_lea.vmem [#allocation2], %s435_s11 }
  0x2a   : > { %s181_s8 = sshll.u32 %s173_s7, 4  ;;  %p40_p9 = scmp.eq.s32.totalorder %s37_s6, 0  ;;  %s182_s8 = int_to_ptr.vmem [resolvable:$true] %s181_s8 }
  0x2b   : > { %s170_s9 = scalar_lea.sflag [#allocation3], %s169_s4  ;;  %p581_p12 = pneg %p794_p4 }
  0x2c   : > { %s826_s30 = scalar_select %p40_p9, %s683_s14, %s42_s20  }
  0x2d   : > { %s592_s28 = scalar_lea.vmem %s182_s8, 128  ;;  %s699_s10 = smov [#allocation2]  }
  0x2e   : > { %p593_p2 = scmp.ne.s32.totalorder %s182_s8, %s592_s28  ;;  %s597_s1 = sshll.u32 %s699_s10, 4  ;;  %s598_s1 = int_to_ptr.vmem [resolvable:$false] %s597_s1 }
  0x2f   : > { %s599_s19 = scalar_lea.vmem %s598_s1, 256  ;;  %p600_p6 = scmp.lt.s32.totalorder %s182_s8, %s598_s1 }
  0x30   : > { %p595_p8 = pnand %p593_p2, %p581_p12  ;;  %p601_p10 = scmp.lt.s32.totalorder %s599_s19, %s592_s28 }
  0x32   : > { %p596_p5 = pneg %p595_p8  ;;  %p602_p11 = por %p601_p10, %p600_p6 }
  0x34   : > { %p603_p1 = pnand %p602_p11, %p596_p5 }
  0x36   : > { %606 = shalt.err (!%p603_p1)
}
  0x37   : > { %s700_s11 = smov 32   ;;  %s701_s20 = smov 2  }
  0x38   : > { %488 = dma.hbm_to_vmem [thread:$0]  (!%p794_p4), %s180_s27, 128, %s182_s8, %s170_s9, %s700_s11, %s700_s11, %s701_s20  }
  0x39   : > { %193 = sbr.rel (%p784_p13) target bundleno = 111 (0x6f), region = 32  ;;  %s835_s4 = sand.u32 (!%p784_p13), 1, %s679_s13  }
  0x3a   : > { %s439_s18 = sshll.u32 (!%p784_p13), %s835_s4, 3  ;;  %s196_s1 = scalar_lea.sflag (!%p784_p13), [#allocation3], %s835_s4 }
  0x3b   : > { %s199_s26 = scalar_lea.vmem (!%p784_p13), [#allocation2], %s439_s18 }
  0x3e   : > { %658 = dma.done.wait (%p769_p7), %s196_s1, 128  }
  0x3f   : > { %660 = vsyncadd (%p769_p7), %s196_s1, 4294967168 }
  0x40   : > { %662 = dma.done.wait (%p763_p3), [#allocation5], 64  }
  0x41   : > { %664 = vsyncadd (%p763_p3), [#allocation5], 4294967232 }
  0x42   : > { %666 = dma.done.wait (%p763_p3), [#allocation6], 16  }
  0x43   : > { %668 = vsyncadd (%p763_p3), [#allocation6], 4294967280 }
  0x44   : > { %212 = sfence }
  0x45   : > { %s241_s25 = sld [smem:[#allocation7]]  ;;  %v231_v0 = vld [vmem:[%s199_s26] sm:$0x3]  ;;  %v442_v1 = vld [vmem:[%s199_s26 + $0x2] sm:$0x3]  ;;  %s464_s19 = smul.u32 6, %s835_s4 }
  0x46   : > { %s445_s29 = sld [smem:[#allocation7 + $0x1]]  ;;  %v443_v2 = vld [vmem:[%s199_s26 + $0x4] sm:$0x3]  ;;  %v444_v4 = vld [vmem:[%s199_s26 + $0x6] sm:$0x3]  ;;  %p926_p7 = scmp.ne.s32.totalorder %s920_s23, 0 }
  0x47   : > { %s446_s27 = sld [smem:[#allocation7 + $0x2]]  ;;  %s230_s26 = scalar_lea.vmem [#allocation9], %s464_s19 }
  0x48   : > { %s447_s6 = sld [smem:[#allocation7 + $0x3]] }
  0x49   : > { %s851_s22 = sld [smem:[#allocation8]] }
  0x4a   : > { %s448_s7 = sld [smem:[#allocation7 + $0x80]] }
  0x4b   : > { %v242_v3 = vstv %s241_s25  ;;  %s449_s8 = sld [smem:[#allocation7 + $0x81]]  ;;  %s315_s25 = sshll.u32 %s230_s26, 4  ;;  %s859_s25 = int_to_ptr.vmem [resolvable:$true] %s315_s25 }
  0x4c   : > { %v243_v5 = vmul.f32 %v242_v3, %v231_v0  ;;  %v245_v6 = vstv %s445_s29  ;;  %s450_s9 = sld [smem:[#allocation7 + $0x82]]  ;;  %s465_s29 = smul.u32 96, %s687_s15 }
  0x4d   : > { %v246_v7 = vmul.f32 %v442_v1, %v245_v6  ;;  %v249_v8 = vstv %s446_s27  ;;  %s451_s21 = sld [smem:[#allocation7 + $0x83]]  ;;  %s702_s15 = smov [#allocation9]  }
  0x4e   : > { %v250_v9 = vmul.f32 %v443_v2, %v249_v8  ;;  %v253_v10 = vstv %s447_s6  ;;  %s853_s28 = sld [smem:[#allocation8 + $0x1]] }
  0x4f   : > { %v247_v11 = vadd.f32 %v246_v7, %v243_v5  ;;  %v254_v12 = vmul.f32 %v444_v4, %v253_v10  ;;  %s454_s10 = sld [smem:[#allocation7 + $0x100]]  ;;  %v257_v17 = vstv %s851_s22  ;;  %s864_s22 = scalar_lea.hbm %s915_s3, %s465_s29 }
  0x50   : > { %v261_v13 = vstv %s448_s7  ;;  %s455_s11 = sld [smem:[#allocation7 + $0x101]]  ;;  %s301_s7 = scalar_lea.sflag [#allocation4], %s835_s4 }
  0x51   : > { %v251_v14 = vadd.f32 %v250_v9, %v247_v11  ;;  %v262_v15 = vmul.f32 %v261_v13, %v231_v0  ;;  %v264_v16 = vstv %s449_s8  ;;  %s456_s20 = sld [smem:[#allocation7 + $0x102]]  ;;  %s607_s8 = scalar_lea.vmem %s859_s25, 96 }
  0x52   : > { %v265_v18 = vmul.f32 %v442_v1, %v264_v16  ;;  %v268_v19 = vstv %s450_s9  ;;  %s457_s18 = sld [smem:[#allocation7 + $0x103]]  ;;  %p608_p3 = scmp.ne.s32.totalorder %s859_s25, %s607_s8 }
  0x53   : > { %v255_v20 = vadd.f32 %v254_v12, %v251_v14  ;;  %v269_v21 = vmul.f32 %v443_v2, %v268_v19  ;;  %v272_v22 = vstv %s451_s21  ;;  %s458_s1 = sld [smem:[#allocation8 + $0x2]]  ;;  %s611_s9 = sshll.u32 %s702_s15, 4  ;;  %s612_s9 = int_to_ptr.vmem [resolvable:$false] %s611_s9 }
  0x54   : > { %v266_v23 = vadd.f32 %v265_v18, %v262_v15  ;;  %v273_v24 = vmul.f32 %v444_v4, %v272_v22  ;;  %v276_v30 = vstv %s853_s28  ;;  %p609_p13 = pnand %p608_p3, %p926_p7  ;;  %s613_s21 = scalar_lea.vmem %s612_s9, 192 }
  0x55   : > { %v258_v25 = vadd.f32 %v257_v17, %v255_v20  ;;  %v281_v26 = vstv %s454_s10  ;;  %p614_p0 = scmp.lt.s32.totalorder %s859_s25, %s612_s9  ;;  %p615_p9 = scmp.lt.s32.totalorder %s613_s21, %s607_s8 }
  0x56   : > { %v270_v27 = vadd.f32 %v269_v21, %v266_v23  ;;  %v282_v28 = vmul.f32 %v281_v26, %v231_v0  ;;  %v284_v29 = vstv %s455_s11  ;;  %p610_p4 = pneg %p609_p13 }
  0x57   : > { %259 = vst [vmem:[%s230_s26] sm:$0x3] %v258_v25  ;;  %v285_v31 = vmul.f32 %v442_v1, %v284_v29  ;;  %v288_v32 = vstv %s456_s20  ;;  %p616_p12 = por %p615_p9, %p614_p0 }
  0x58   : > { %v274_v33 = vadd.f32 %v273_v24, %v270_v27  ;;  %v289_v34 = vmul.f32 %v443_v2, %v288_v32  ;;  %v292_v35 = vstv %s457_s18 }
  0x59   : > { %v286_v36 = vadd.f32 %v285_v31, %v282_v28  ;;  %v293_v37 = vmul.f32 %v444_v4, %v292_v35  ;;  %v296_v40 = vstv %s458_s1  ;;  %p617_p2 = pnand %p616_p12, %p610_p4 }
  0x5a   : > { %v277_v38 = vadd.f32 %v276_v30, %v274_v33 }
  0x5b   : > { %v290_v39 = vadd.f32 %v289_v34, %v286_v36 }
  0x5c   : > { %453 = vst [vmem:[%s230_s26 + $0x2] sm:$0x3] %v277_v38 }
  0x5d   : > { %v294_v41 = vadd.f32 %v293_v37, %v290_v39 }
  0x5f   : > { %v297_v42 = vadd.f32 %v296_v40, %v294_v41 }
  0x61   : > { %459 = vst [vmem:[%s230_s26 + $0x4] sm:$0x3] %v297_v42 }
  0x62   : > { %620 = shalt.err (!%p617_p2)
}
  0x63   : > { %s621_s28 = scalar_lea.hbm %s864_s22, 96  ;;  %s625_s11 = scalar_lea.hbm %s915_s3, 192 }
  0x64   : > { %p622_p8 = scmp.ne.s32.totalorder %s864_s22, %s621_s28  ;;  %p626_p10 = scmp.lt.s32.totalorder %s864_s22, %s915_s3 }
  0x65   : > { %p627_p11 = scmp.lt.s32.totalorder %s625_s11, %s621_s28 }
  0x66   : > { %p623_p5 = pnand %p622_p8, %p926_p7 }
  0x67   : > { %p628_p1 = por %p627_p11, %p626_p10 }
  0x68   : > { %p624_p6 = pneg %p623_p5 }
  0x6a   : > { %p629_p3 = pnand %p628_p1, %p624_p6 }
  0x6c   : > { %632 = shalt.err (!%p629_p3)
}
  0x6d   : > { %s703_s1 = smov 32   ;;  %s704_s26 = smov 2  }
  0x6e   : > { %476 = dma.vmem_to_hbm [thread:$0]  (%p926_p7), %s859_s25, 96, %s864_s22, %s301_s7, %s703_s1, %s703_s1, %s704_s26  }
  0x6f PF: > { %s330_s29 = sand.u32 1, %s675_s12   ;;  %p927_p13 = scmp.ne.s32.totalorder %s921_s24, 0 }
  0x70   : > { %p928_p4 = scmp.ge.s32.totalorder %s695_s17, 2  ;;  %s331_s27 = scalar_lea.sflag [#allocation4], %s330_s29 }
  0x72   : > { %p490_p0 = pnand %p928_p4, %p927_p13 }
  0x74   : > { %p491_p9 = pneg %p490_p0 }
  0x76   : > { %670 = dma.done.wait (%p491_p9), %s331_s27, 96  }
  0x77   : > { %672 = vsyncadd (%p491_p9), %s331_s27, 4294967200  ;;  %s21_s17 = sadd.s32 1, %s695_s17   ;;  %s929_s12 = smov %s679_s13 }
  0x78   : > { %p18_p12 = scmp.ge.s32.totalorder %s21_s17, 4   ;;  %s930_s13 = smov %s683_s14 }
  0x79   : > { %s931_s14 = smov %s826_s30  ;;  %s932_s15 = smov %s691_s16 }
  0x7a   : > { %s933_s16 = smov %s935_s5  ;;  %20 = sbr.rel (!%p18_p12) target bundleno = 10 (0xa), region = 92 }
  0x7f   :  { %336 = vsyncpa [#allocation3], 1 }
  0x80   :  { %338 = vsyncpa [#allocation3 + $0x1], 1 }
  0x81   :  { %339 = vsyncpa [#allocation4], 1 }
  0x82   :  { %341 = vsyncpa [#allocation4 + $0x1], 1 }
  0x83   :  { %342 = vsyncpa [#allocation5], 1 }
  0x84   :  { %344 = vsyncpa [#allocation5 + $0x1], 1 }
  0x85   :  { %345 = vsyncpa [#allocation6], 1 }
  0x86   :  { %347 = vsyncpa [#allocation6 + $0x1], 1 }

</bundles_post_ra>
